<compile_context>
chip_gen: v7x
topology: tpu7x:2x2x1
jax: 0.10.0
libtpu: 0.0.40
codegen_flags: <defaults>
</compile_context>

<pallas_src>
import functools

import jax
import jax.numpy as jnp
from jax.experimental import pallas as pl
from jax.experimental.pallas import tpu as pltpu


def _round_up(x, m):
    return ((x + m - 1) // m) * m


def _itemsize(dt):
    return jnp.dtype(dt).itemsize


def _tpu_info():
    """Returns (device_kind, physical VMEM bytes, has-bf16-EUP-path)."""
    kind = ""
    try:
        kind = jax.devices()[0].device_kind.lower()
    except Exception:
        pass
    vmem = None
    try:
        vmem = int(pltpu.get_tpu_info().vmem_capacity_bytes)
    except Exception:
        vmem = None
    if not vmem or vmem <= 0:
        if "7" in kind:                       # v7x: 64 MiB per TensorCore
            vmem = 64 << 20
        elif ("v2" in kind) or ("v3" in kind):
            vmem = 16 << 20
        else:                                 # v4 / v5e / v5p / v6e
            vmem = 128 << 20
    bf16_ok = ("v6" in kind) or ("7" in kind)  # bf16 EUP/VPU on v6e and v7x
    return kind, vmem, bf16_ok


def _default_energy_dtype():
    _, _, bf16_ok = _tpu_info()
    return jnp.bfloat16 if bf16_ok else jnp.float32


def _step_vmem_bytes(bt, q_size, m_len, k_size, hidden,
                     q_dtype, mem_dtype, energy_dtype):
    """VMEM footprint of one grid step: blocks + scratch + intermediates."""
    f32 = 4
    # Double-buffered blocks (block index varies across grid steps).
    dyn = 2 * (bt * q_size * _itemsize(q_dtype)            # query rows
               + bt * m_len * k_size * _itemsize(mem_dtype)  # memory rows
               + bt * m_len * f32                            # additive mask bias
               + bt * k_size * _itemsize(mem_dtype)          # attn out
               + bt * m_len * f32)                           # weights out
    # Constant-index-map blocks are revisited, not re-buffered.
    const = (q_size * hidden + k_size * hidden + 2 * hidden) * f32
    # Persistent scratch: cached key projection.
    scratch = bt * m_len * hidden * f32
    # In-kernel intermediates: energy (energy dtype) + tanh/product (f32) over
    # [bt, m_len, H], f32 memory copy + weighted product over [bt, m_len, k],
    # plus small softmax temporaries.
    inter = (bt * m_len * hidden * (_itemsize(energy_dtype) + 2 * f32)
             + 2 * bt * m_len * k_size * f32
             + 4 * bt * m_len * f32)
    return dyn + const + scratch + inter


def _bahdanau_kernel(q_ref, mem_ref, maskb_ref, wq_ref, wk_ref, bias_ref, v_ref,
                     attn_ref, w_ref, kp_sc,
                     *, bt, m_len, k_size, hidden, energy_dtype):
    f32 = jnp.float32

    # Key projection (+ pre-summed query/key biases), computed once per batch
    # tile (q == 0) on the MXU and cached in VMEM scratch for all query rows.
    @pl.when(pl.program_id(1) == 0)
    def _():
        kp_sc[...] = (jnp.dot(mem_ref[...].astype(f32), wk_ref[...].astype(f32),
                              preferred_element_type=f32)
                      + bias_ref[...].astype(f32))

    # Query projection for the current query row of this tile: [bt, H].
    qp = jnp.dot(q_ref[...].astype(f32), wq_ref[...].astype(f32),
                 preferred_element_type=f32)

    kp3 = kp_sc[...].reshape(bt, m_len, hidden)        # m_len % 8 == 0 -> no relayout
    vb = v_ref[...].astype(f32).reshape(1, 1, hidden)  # hoisted broadcast base

    # Additive energies. tanh funnels through the single EUP slot, so on
    # v6e/v7x it is evaluated in bf16 (~2x EUP throughput, half the live
    # intermediate); the H-reduction accumulates in f32.
    energy = (qp[:, None, :] + kp3).astype(energy_dtype)
    t = jnp.tanh(energy).astype(f32)                   # [bt, m_len, H]
    logits = jnp.sum(t * vb, axis=-1) + maskb_ref[...]  # [bt, m_len]

    # Softmax over memory positions; divide goes to the EUP (approx recip).
    mx = jnp.max(logits, axis=-1, keepdims=True)
    ex = jnp.exp(logits - mx)
    w = ex * pl.reciprocal(jnp.sum(ex, axis=-1, keepdims=True), approx=True)

    # Context vector: VPU weighted sum with f32 accumulation (batch stays on
    # sublanes) instead of bt serialized 1 x m_len x k MXU calls.
    mem3 = mem_ref[...].astype(f32).reshape(bt, m_len, k_size)
    attn = jnp.sum(w[:, :, None] * mem3, axis=1)       # [bt, k_size]

    w_ref[...] = w.astype(w_ref.dtype)
    attn_ref[...] = attn.astype(attn_ref.dtype)


def bahdanau_attention(query, memory, params, mask=None, *,
                       b_tile=None, energy_dtype=None):
    """Forward pass matching BahdanauAttention.forward (cache path not used)."""
    one_step = query.ndim == 2
    if one_step:
        query = query[:, None, :]

    B, q_len, q_size = query.shape
    _, m_len, k_size = memory.shape
    H = params["wq"].shape[1]
    f32 = jnp.float32

    _kind, vmem_phys, bf16_ok = _tpu_info()
    if energy_dtype is None:
        energy_dtype = jnp.bfloat16 if bf16_ok else jnp.float32

    # Sublane-align batch and memory length so every 2-D block satisfies the
    # (8, 128) rule and the in-kernel reshapes are free relabelings.
    B_p = _round_up(B, 8)
    m_len_p = _round_up(m_len, 8)

    # Per-generation scoped-VMEM cap: ~3/4 of physical (48 MiB v7x, 96 MiB
    # v5e/v6e); leave a little headroom when sizing the batch tile.
    vmem_cap = (3 * vmem_phys) // 4
    budget = max(vmem_cap - (4 << 20), 4 << 20)

    def step_bytes(bt):
        return _step_vmem_bytes(bt, q_size, m_len_p, k_size, H,
                                query.dtype, memory.dtype, energy_dtype)

    if b_tile is None:
        cands = [d for d in range(8, B_p + 1, 8) if B_p % d == 0]
        fits = [d for d in cands if step_bytes(d) <= budget] or [8]
        # Prefer >= 2 batch steps (megacore sharding + DMA/compute overlap),
        # then the largest tile that fits (MXU row fill).
        multi = [d for d in fits if B_p // d >= 2]
        b_tile = max(multi) if multi else max(fits)
    assert b_tile % 8 == 0 and B_p % b_tile == 0, \
        "b_tile must be a multiple of 8 dividing the padded batch"

    nb = B_p // b_tile
    grid = (nb, q_len)

    # --- host-side data prep -------------------------------------------------
    pad_b = B_p - B
    pad_m = m_len_p - m_len
    q_p = jnp.pad(query, ((0, pad_b), (0, 0), (0, 0))) if pad_b else query
    mem_p = memory
    if pad_b or pad_m:
        mem_p = jnp.pad(memory, ((0, pad_b), (0, pad_m), (0, 0)))

    # Fold the scalar logit bias and the PAD mask into one additive bias
    # (-1e18 + bl on PAD == masked_fill(-1e18) in f32); padded m columns get
    # -1e30 so they carry exactly zero weight.
    bl = params["bl"].reshape(()).astype(f32)
    if mask is None:
        core = jnp.full((B, m_len), bl, f32)
    else:
        core = (jnp.where(mask.astype(bool), jnp.float32(-1e18), jnp.float32(0.0))
                + bl).astype(f32)
    mask_bias = jnp.full((B_p, m_len_p), jnp.float32(-1e30), f32)
    mask_bias = mask_bias.at[:B, :m_len].set(core)

    # Query rows flattened q-major so each (b_tile, q_size) block is a
    # contiguous, lane/sublane-dense slab per grid step; memory stays b-major.
    q2d = jnp.transpose(q_p, (1, 0, 2)).reshape(q_len * B_p, q_size)
    mem2d = mem_p.reshape(B_p * m_len_p, k_size)

    wq = params["wq"]
    wk = params["wk"]
    bias_sum = (params["bq"] + params["bk"]).reshape(1, H).astype(f32)
    v = params["v"].reshape(1, H).astype(f32)

    # --- pallas call ----------------------------------------------------------
    kernel = functools.partial(
        _bahdanau_kernel, bt=b_tile, m_len=m_len_p, k_size=k_size,
        hidden=H, energy_dtype=energy_dtype)

    def qmajor(b, q):
        return (q * nb + b, 0)

    def bmajor(b, q):
        return (b, 0)

    def const(b, q):
        return (0, 0)

    in_specs = [
        pl.BlockSpec((b_tile, q_size), qmajor),            # query rows (q-major)
        pl.BlockSpec((b_tile * m_len_p, k_size), bmajor),   # memory rows (b-major)
        pl.BlockSpec((b_tile, m_len_p), bmajor),            # additive mask bias
        pl.BlockSpec((q_size, H), const),                   # wq
        pl.BlockSpec((k_size, H), const),                   # wk
        pl.BlockSpec((1, H), const),                        # bq + bk
        pl.BlockSpec((1, H), const),                        # v
    ]
    out_specs = [
        pl.BlockSpec((b_tile, k_size), qmajor),
        pl.BlockSpec((b_tile, m_len_p), qmajor),
    ]
    out_shape = (
        jax.ShapeDtypeStruct((q_len * B_p, k_size), memory.dtype),
        jax.ShapeDtypeStruct((q_len * B_p, m_len_p), f32),
    )

    vmem_limit = int(min(vmem_cap, max(step_bytes(b_tile) + (8 << 20), 32 << 20)))

    attn2d, w2d = pl.pallas_call(
        kernel,
        out_shape=out_shape,
        grid_spec=pltpu.PrefetchScalarGridSpec(
            num_scalar_prefetch=0,
            grid=grid,
            in_specs=in_specs,
            out_specs=out_specs,
            scratch_shapes=[pltpu.VMEM((b_tile * m_len_p, H), f32)],
        ),
        compiler_params=pltpu.CompilerParams(
            dimension_semantics=("parallel", "arbitrary"),
            vmem_limit_bytes=vmem_limit,
        ),
    )(q2d, mem2d, mask_bias, wq, wk, bias_sum, v)

    attns = jnp.transpose(attn2d.reshape(q_len, B_p, k_size), (1, 0, 2))[:B]
    weights = jnp.transpose(w2d.reshape(q_len, B_p, m_len_p), (1, 0, 2))[:B, :, :m_len]
    if one_step:
        attns = attns[:, 0, :]
    return attns, weights


def bahdanau_reference(query, memory, params, mask=None):
    """Pure-JAX reference mirroring the PyTorch forward."""
    one_step = query.ndim == 2
    if one_step:
        query = query[:, None, :]
    qp = query @ params["wq"] + params["bq"]
    kp = memory @ params["wk"] + params["bk"]
    t = jnp.tanh(qp[:, :, None, :] + kp[:, None, :, :])
    logits = jnp.einsum('bqmh,h->bqm', t, params["v"]) + params["bl"][0]
    if mask is not None:
        logits = jnp.where(mask[:, None, :], -1e18, logits)
    w = jax.nn.softmax(logits, axis=-1)
    attns = jnp.einsum('bqm,bmk->bqk', w, memory)
    if one_step:
        attns = attns[:, 0]
    return attns, w


if __name__ == "__main__":
    # Module-implied sizes: query_size, key_size, hidden_size (default = key_size).
    B, QUERY_SIZE, KEY_SIZE, HIDDEN, M_LEN = 2, 32, 32, 32, 16

    key = jax.random.PRNGKey(0)
    ks = jax.random.split(key, 8)

    # Deterministic parameter init (synthetic; stands in for my_init.default_init).
    params = {
        "wq": 0.1 * jax.random.normal(ks[0], (QUERY_SIZE, HIDDEN), jnp.float32),
        "bq": 0.1 * jax.random.normal(ks[1], (HIDDEN,), jnp.float32),
        "wk": 0.1 * jax.random.normal(ks[2], (KEY_SIZE, HIDDEN), jnp.float32),
        "bk": 0.1 * jax.random.normal(ks[3], (HIDDEN,), jnp.float32),
        "v":  0.1 * jax.random.normal(ks[4], (HIDDEN,), jnp.float32),
        "bl": 0.1 * jax.random.normal(ks[5], (1,), jnp.float32),
    }

    # Inputs: one-step decoder query (2-D) + encoder memory + PAD mask.
    query = jax.random.normal(ks[6], (B, QUERY_SIZE), jnp.float32)
    memory = jax.random.normal(ks[7], (B, M_LEN, KEY_SIZE), jnp.float32)
    pos = jnp.arange(M_LEN)[None, :]
    mask = pos >= jnp.array([[12], [16]])     # batch0 pads last 4, batch1 no pad

    attns, weights = bahdanau_attention(query, memory, params, mask=mask)
    jax.block_until_ready((attns, weights))

    ref_attns, ref_weights = bahdanau_reference(query, memory, params, mask=mask)

    assert attns.shape == (B, KEY_SIZE)
    assert weights.shape == (B, 1, M_LEN)

    # Tolerances depend on the energy dtype auto-selected for this chip:
    # bf16 tanh on v6e/v7x, f32 elsewhere (approx-reciprocal softmax in both).
    if jnp.dtype(_default_energy_dtype()) == jnp.dtype(jnp.bfloat16):
        a_rtol, a_atol, w_rtol, w_atol = 3e-2, 2.5e-2, 3e-2, 1.5e-2
    else:
        a_rtol, a_atol, w_rtol, w_atol = 2e-3, 1e-3, 2e-3, 1e-3

    assert jnp.allclose(attns, ref_attns, rtol=a_rtol, atol=a_atol), \
        float(jnp.max(jnp.abs(attns - ref_attns)))
    assert jnp.allclose(weights, ref_weights, rtol=w_rtol, atol=w_atol), \
        float(jnp.max(jnp.abs(weights - ref_weights)))

    print("KERNEL_OK")
</pallas_src>

<mosaic_0001>
module attributes {stable_mosaic.version = 11 : i64} {
  func.func @_bahdanau_kernel(%arg0: i32, %arg1: i32, %arg2: memref<8x32xf32, #tpu.memory_space<vmem>>, %arg3: memref<128x32xf32, #tpu.memory_space<vmem>>, %arg4: memref<8x16xf32, #tpu.memory_space<vmem>>, %arg5: memref<32x32xf32, #tpu.memory_space<vmem>>, %arg6: memref<32x32xf32, #tpu.memory_space<vmem>>, %arg7: memref<1x32xf32, #tpu.memory_space<vmem>>, %arg8: memref<1x32xf32, #tpu.memory_space<vmem>>, %arg9: memref<8x32xf32, #tpu.memory_space<vmem>>, %arg10: memref<8x16xf32, #tpu.memory_space<vmem>>, %arg11: memref<128x32xf32, #tpu.memory_space<vmem>>) attributes {dimension_semantics = [#tpu.dimension_semantics<parallel>, #tpu.dimension_semantics<arbitrary>], iteration_bounds = array<i64: 1, 1>, scalar_prefetch = 0 : i64, scratch_operands = 1 : i64, tpu.core_type = #tpu.core_type<tc>, window_params = [{transform_indices = @transform_0, window_bounds = array<i64: 8, 32>}, {transform_indices = @transform_1, window_bounds = array<i64: 128, 32>}, {transform_indices = @transform_2, window_bounds = array<i64: 8, 16>}, {pipeline_mode = #tpu.pipeline_mode<synchronous>, transform_indices = @transform_3, window_bounds = array<i64: 32, 32>}, {pipeline_mode = #tpu.pipeline_mode<synchronous>, transform_indices = @transform_4, window_bounds = array<i64: 32, 32>}, {pipeline_mode = #tpu.pipeline_mode<synchronous>, transform_indices = @transform_5, window_bounds = array<i64: 1, 32>}, {pipeline_mode = #tpu.pipeline_mode<synchronous>, transform_indices = @transform_6, window_bounds = array<i64: 1, 32>}, {transform_indices = @transform_7, window_bounds = array<i64: 8, 32>}, {transform_indices = @transform_8, window_bounds = array<i64: 8, 16>}]} {
    %c0_i32 = arith.constant 0 : i32
    %0 = arith.cmpi eq, %arg1, %c0_i32 : i32
    %1 = arith.extui %0 : i1 to i32
    %c0_i32_0 = arith.constant 0 : i32
    %2 = arith.cmpi ne, %1, %c0_i32_0 : i32
    scf.if %2 {
      %c0_20 = arith.constant 0 : index
      %c0_21 = arith.constant 0 : index
      %37 = vector.load %arg3[%c0_20, %c0_21] : memref<128x32xf32, #tpu.memory_space<vmem>>, vector<128x32xf32>
      %c0_22 = arith.constant 0 : index
      %c0_23 = arith.constant 0 : index
      %38 = vector.load %arg6[%c0_22, %c0_23] : memref<32x32xf32, #tpu.memory_space<vmem>>, vector<32x32xf32>
      %cst_24 = arith.constant dense<0.000000e+00> : vector<128x32xf32>
      %39 = tpu.matmul %37, %38, %cst_24 {dimension_numbers = #tpu.dot_dimension_numbers<[1], [0], [0], [1], [0, 0, 1, 1], [], []>} : vector<128x32xf32>, vector<32x32xf32>, vector<128x32xf32> -> vector<128x32xf32>
      %c0_25 = arith.constant 0 : index
      %c0_26 = arith.constant 0 : index
      %40 = vector.load %arg7[%c0_25, %c0_26] : memref<1x32xf32, #tpu.memory_space<vmem>>, vector<1x32xf32>
      %41 = vector.broadcast %40 : vector<1x32xf32> to vector<128x32xf32>
      %42 = arith.addf %39, %41 : vector<128x32xf32>
      %c0_27 = arith.constant 0 : index
      %c0_28 = arith.constant 0 : index
      %43 = vector.load %arg11[%c0_27, %c0_28] : memref<128x32xf32, #tpu.memory_space<vmem>>, vector<128x32xf32>
      tpu.vector_store %arg11[%c0_27, %c0_28], %42 {strides = array<i32>} : memref<128x32xf32, #tpu.memory_space<vmem>>, vector<128x32xf32>,
    } else {
    }
    %c0 = arith.constant 0 : index
    %c0_1 = arith.constant 0 : index
    %3 = vector.load %arg2[%c0, %c0_1] : memref<8x32xf32, #tpu.memory_space<vmem>>, vector<8x32xf32>
    %c0_2 = arith.constant 0 : index
    %c0_3 = arith.constant 0 : index
    %4 = vector.load %arg5[%c0_2, %c0_3] : memref<32x32xf32, #tpu.memory_space<vmem>>, vector<32x32xf32>
    %cst = arith.constant dense<0.000000e+00> : vector<8x32xf32>
    %5 = tpu.matmul %3, %4, %cst {dimension_numbers = #tpu.dot_dimension_numbers<[1], [0], [0], [1], [0, 0, 1, 1], [], []>} : vector<8x32xf32>, vector<32x32xf32>, vector<8x32xf32> -> vector<8x32xf32>
    %c0_4 = arith.constant 0 : index
    %c0_5 = arith.constant 0 : index
    %6 = vector.load %arg11[%c0_4, %c0_5] : memref<128x32xf32, #tpu.memory_space<vmem>>, vector<128x32xf32>
    %7 = vector.shape_cast %6 : vector<128x32xf32> to vector<8x16x32xf32>
    %c0_6 = arith.constant 0 : index
    %c0_7 = arith.constant 0 : index
    %8 = vector.load %arg8[%c0_6, %c0_7] : memref<1x32xf32, #tpu.memory_space<vmem>>, vector<1x32xf32>
    %9 = vector.shape_cast %8 : vector<1x32xf32> to vector<1x1x32xf32>
    %10 = vector.shape_cast %5 : vector<8x32xf32> to vector<8x1x32xf32>
    %11 = vector.broadcast %10 : vector<8x1x32xf32> to vector<8x16x32xf32>
    %12 = arith.addf %11, %7 : vector<8x16x32xf32>
    %13 = math.tanh %12 : vector<8x16x32xf32>
    %14 = vector.broadcast %9 : vector<1x1x32xf32> to vector<8x16x32xf32>
    %15 = arith.mulf %13, %14 : vector<8x16x32xf32>
    %cst_8 = arith.constant dense<0.000000e+00> : vector<8x16xf32>
    %16 = vector.multi_reduction <add>, %15, %cst_8 [2] : vector<8x16x32xf32> to vector<8x16xf32>
    %c0_9 = arith.constant 0 : index
    %c0_10 = arith.constant 0 : index
    %17 = vector.load %arg4[%c0_9, %c0_10] : memref<8x16xf32, #tpu.memory_space<vmem>>, vector<8x16xf32>
    %18 = arith.addf %16, %17 : vector<8x16xf32>
    %cst_11 = arith.constant dense<0xFF800000> : vector<8xf32>
    %19 = vector.multi_reduction <maximumf>, %18, %cst_11 [1] : vector<8x16xf32> to vector<8xf32>
    %20 = vector.shape_cast %19 : vector<8xf32> to vector<8x1xf32>
    %21 = vector.broadcast %20 : vector<8x1xf32> to vector<8x16xf32>
    %22 = arith.subf %18, %21 : vector<8x16xf32>
    %23 = math.exp %22 : vector<8x16xf32>
    %cst_12 = arith.constant dense<0.000000e+00> : vector<8xf32>
    %24 = vector.multi_reduction <add>, %23, %cst_12 [1] : vector<8x16xf32> to vector<8xf32>
    %25 = vector.shape_cast %24 : vector<8xf32> to vector<8x1xf32>
    %26 = tpu.reciprocal %25 {approx = true} : vector<8x1xf32> -> vector<8x1xf32>
    %27 = vector.broadcast %26 : vector<8x1xf32> to vector<8x16xf32>
    %28 = arith.mulf %23, %27 : vector<8x16xf32>
    %c0_13 = arith.constant 0 : index
    %c0_14 = arith.constant 0 : index
    %29 = vector.load %arg3[%c0_13, %c0_14] : memref<128x32xf32, #tpu.memory_space<vmem>>, vector<128x32xf32>
    %30 = vector.shape_cast %29 : vector<128x32xf32> to vector<8x16x32xf32>
    %31 = vector.shape_cast %28 : vector<8x16xf32> to vector<8x16x1xf32>
    %32 = vector.broadcast %31 : vector<8x16x1xf32> to vector<8x16x32xf32>
    %33 = arith.mulf %32, %30 : vector<8x16x32xf32>
    %cst_15 = arith.constant dense<0.000000e+00> : vector<8x32xf32>
    %34 = vector.multi_reduction <add>, %33, %cst_15 [1] : vector<8x16x32xf32> to vector<8x32xf32>
    %c0_16 = arith.constant 0 : index
    %c0_17 = arith.constant 0 : index
    %35 = vector.load %arg10[%c0_16, %c0_17] : memref<8x16xf32, #tpu.memory_space<vmem>>, vector<8x16xf32>
    tpu.vector_store %arg10[%c0_16, %c0_17], %28 {strides = array<i32>} : memref<8x16xf32, #tpu.memory_space<vmem>>, vector<8x16xf32>,
    %c0_18 = arith.constant 0 : index
    %c0_19 = arith.constant 0 : index
    %36 = vector.load %arg9[%c0_18, %c0_19] : memref<8x32xf32, #tpu.memory_space<vmem>>, vector<8x32xf32>
    tpu.vector_store %arg9[%c0_18, %c0_19], %34 {strides = array<i32>} : memref<8x32xf32, #tpu.memory_space<vmem>>, vector<8x32xf32>,
    return
  }
  func.func @transform_0(%arg0: i32, %arg1: i32) -> (i32, i32) {
    %c1_i32 = arith.constant 1 : i32
    %0 = arith.muli %arg1, %c1_i32 : i32
    %1 = arith.addi %0, %arg0 : i32
    %c0_i32 = arith.constant 0 : i32
    %c0_i32_0 = arith.constant 0 : i32
    return %1, %c0_i32 : i32, i32
  }
  func.func @transform_1(%arg0: i32, %arg1: i32) -> (i32, i32) {
    %c0_i32 = arith.constant 0 : i32
    %c0_i32_0 = arith.constant 0 : i32
    return %arg0, %c0_i32 : i32, i32
  }
  func.func @transform_2(%arg0: i32, %arg1: i32) -> (i32, i32) {
    %c0_i32 = arith.constant 0 : i32
    %c0_i32_0 = arith.constant 0 : i32
    return %arg0, %c0_i32 : i32, i32
  }
  func.func @transform_3(%arg0: i32, %arg1: i32) -> (i32, i32) {
    %c0_i32 = arith.constant 0 : i32
    %c0_i32_0 = arith.constant 0 : i32
    %c0_i32_1 = arith.constant 0 : i32
    return %c0_i32, %c0_i32_0 : i32, i32
  }
  func.func @transform_4(%arg0: i32, %arg1: i32) -> (i32, i32) {
    %c0_i32 = arith.constant 0 : i32
    %c0_i32_0 = arith.constant 0 : i32
    %c0_i32_1 = arith.constant 0 : i32
    return %c0_i32, %c0_i32_0 : i32, i32
  }
  func.func @transform_5(%arg0: i32, %arg1: i32) -> (i32, i32) {
    %c0_i32 = arith.constant 0 : i32
    %c0_i32_0 = arith.constant 0 : i32
    %c0_i32_1 = arith.constant 0 : i32
    return %c0_i32, %c0_i32_0 : i32, i32
  }
  func.func @transform_6(%arg0: i32, %arg1: i32) -> (i32, i32) {
    %c0_i32 = arith.constant 0 : i32
    %c0_i32_0 = arith.constant 0 : i32
    %c0_i32_1 = arith.constant 0 : i32
    return %c0_i32, %c0_i32_0 : i32, i32
  }
  func.func @transform_7(%arg0: i32, %arg1: i32) -> (i32, i32) {
    %c1_i32 = arith.constant 1 : i32
    %0 = arith.muli %arg1, %c1_i32 : i32
    %1 = arith.addi %0, %arg0 : i32
    %c0_i32 = arith.constant 0 : i32
    %c0_i32_0 = arith.constant 0 : i32
    return %1, %c0_i32 : i32, i32
  }
  func.func @transform_8(%arg0: i32, %arg1: i32) -> (i32, i32) {
    %c1_i32 = arith.constant 1 : i32
    %0 = arith.muli %arg1, %c1_i32 : i32
    %1 = arith.addi %0, %arg0 : i32
    %c0_i32 = arith.constant 0 : i32
    %c0_i32_0 = arith.constant 0 : i32
    return %1, %c0_i32 : i32, i32
  }
}

</mosaic_0001>

<bundles_post_ra>
// kernel: tpu_custom_call.1
= control target key start
LH: loop header
LB: loop body
LE: loop exit
PB: predicated region body
PF: predicated region fallthrough
CT: control target
= control target key end

     0   :  { %14 = vsyncpa [#allocation4], 0  ;;  %vm80_vm0 = vcmask 261120   ;;  %v391_v3 = vlaneseq  ;;  %v1704_v17 = vmov 0.0|0.0   ;;  %s2364_s0 = inlined_call_operand.vmem [shape: f32[8,32], index: 0, kind: input, shape index: {}]   ;;  %s2365_s1 = inlined_call_operand.vmem [shape: f32[128,32], index: 1, kind: input, shape index: {}]   ;;  %s2366_s2 = inlined_call_operand.vmem [shape: f32[8,16], index: 2, kind: input, shape index: {}]   ;;  %s2367_s3 = inlined_call_operand.vmem [shape: f32[32,32], index: 3, kind: input, shape index: {}]   ;;  %s2368_s4 = inlined_call_operand.vmem [shape: f32[32,32], index: 4, kind: input, shape index: {}]   ;;  %s2369_s5 = inlined_call_operand.vmem [shape: f32[1,32], index: 5, kind: input, shape index: {}]   ;;  %s2370_s6 = inlined_call_operand.vmem [shape: f32[1,32], index: 6, kind: input, shape index: {}]   ;;  %s2371_s7 = inlined_call_operand.hbm [shape: f32[8,32], index: 7, kind: output, shape index: {0}]   ;;  %s2372_s8 = inlined_call_operand.hbm [shape: f32[8,16], index: 8, kind: output, shape index: {1}]  }
   0x1   :  { %v69_v0 = vld [vmem:[%s2368_s4] sm:$0xff]  ;;  %v70_v1 = vld [vmem:[%s2368_s4 + $0x8] sm:$0xff]  ;;  %v71_v2 = vld [vmem:[%s2368_s4 + $0x10] sm:$0xff] }
   0x2   :  { %v1562_v4 = vpack.c.bf16 %v70_v1, %v69_v0  ;;  %v72_v5 = vld [vmem:[%s2368_s4 + $0x18] sm:$0xff]  ;;  %v53_v6 = vld [vmem:[%s2365_s1] sm:$0xff]  ;;  %v63_v7 = vld [vmem:[%s2365_s1 + $0x50] sm:$0xff]  ;;  %v1777_v9 = vshrl.u32 %v391_v3, 7 }
   0x3   :  { %v1566_v8 = vpack.c.bf16 %v72_v5, %v71_v2  ;;  %1527 = vmatprep.mubr.msk.f32.mxu0 %vm80_vm0, %v53_v6  ;;  %1542 = vmatprep.mubr.msk.f32.mxu1 %vm80_vm0, %v63_v7  ;;  %v291_v10 = vld [vmem:[%s2367_s3] sm:$0xff]  ;;  %v292_v11 = vld [vmem:[%s2367_s3 + $0x8] sm:$0xff]  ;;  %v64_v14 = vld [vmem:[%s2365_s1 + $0x58] sm:$0xff] }
   0x4   :  { %1563 = vmatprep.subr.bf16.mxu0 %v1562_v4  ;;  %1576 = vmatprep.subr.bf16.mxu1 %v1562_v4  ;;  %v1786_v12 = vsub.s32 0, %v1777_v9  ;;  %v54_v13 = vld [vmem:[%s2365_s1 + $0x8] sm:$0xff]  ;;  %v1571_v15 = vpack.c.bf16 %v292_v11, %v291_v10  ;;  %v1797_v16 = vld [vmem:[%s2366_s2] sm:$0xff]  ;;  %v55_v18 = vld [vmem:[%s2365_s1 + $0x10] sm:$0xff] }
   0x5   :  { %1565 = vmatpush3.bf16.msra.mxu0 %v1562_v4  ;;  %1578 = vmatpush3.bf16.msra.mxu1 %v1562_v4 }
   0x6   :  { %1567 = vmatprep.subr.bf16.mxu0 %v1566_v8  ;;  %1577 = vmatprep.subr.bf16.mxu1 %v1566_v8 }
   0x9   :  { %1569 = vmatpush3.bf16.msra.mxu0 %v1566_v8  ;;  %1579 = vmatpush3.bf16.msra.mxu1 %v1566_v8 }
   0xa   :  { %1570 = vmatprep.subr.bf16.mxu1 %v1704_v17 }
   0xb   :  { %15 = vsyncpa [#allocation6], 0  ;;  %v65_v19 = vld [vmem:[%s2365_s1 + $0x60] sm:$0xff]  ;;  %v293_v20 = vld [vmem:[%s2367_s3 + $0x10] sm:$0xff]  ;;  %v583_v22 = vrot.slane %v1797_v16, %v1786_v12  ;;  %v1814_v23 = vsub.s32 1, %v1777_v9  ;;  %v1826_v26 = vsub.s32 2, %v1777_v9 }
   0xc   :  { %v294_v21 = vld [vmem:[%s2367_s3 + $0x18] sm:$0xff]  ;;  %1528 = vmatmul.mubr.msk.f32.vlgmr.msra.gmra.mrb[0].mxu0 %vm80_vm0, %v54_v13  ;;  %1543 = vmatmul.mubr.msk.f32.vlgmr.msra.gmra.mrb[0].mxu1 %vm80_vm0, %v64_v14  ;;  %v66_v25 = vld [vmem:[%s2365_s1 + $0x68] sm:$0xff]  ;;  %v57_v27 = vld [vmem:[%s2365_s1 + $0x20] sm:$0xff]  ;;  %v1850_v34 = vsub.s32 3, %v1777_v9  ;;  %vm1705_vm1 = vmmov 0   ;;  %v1706_v36 = vmov 0.0  }
   0xd   :  { %1572 = vmatpush3.bf16.msra.mxu1 %v1571_v15  ;;  %1530 = vmatprep.mubr.msk.f32.mxu0 %vm80_vm0, %v55_v18  ;;  %v56_v24 = vld [vmem:[%s2365_s1 + $0x18] sm:$0xff]  ;;  %v67_v28 = vld [vmem:[%s2365_s1 + $0x70] sm:$0xff]  ;;  %v1574_v29 = vpack.c.bf16 %v294_v21, %v293_v20  ;;  %v594_v30 = vrot.slane %v1797_v16, %v1814_v23  ;;  %v58_v31 = vld [vmem:[%s2365_s1 + $0x28] sm:$0xff]  ;;  %v605_v33 = vrot.slane %v1797_v16, %v1826_v26  ;;  %v1867_v40 = vsub.s32 4, %v1777_v9  ;;  %s1709_s13 = smov [#allocation5]  }
   0xe   :  { %1545 = vmatprep.mubr.msk.f32.mxu1 %vm80_vm0, %v65_v19  ;;  %1573 = vmatprep.subr.bf16.mxu1 %v1704_v17  ;;  %v68_v32 = vld [vmem:[%s2365_s1 + $0x78] sm:$0xff]  ;;  %v59_v35 = vld [vmem:[%s2365_s1 + $0x30] sm:$0xff]  ;;  %v290_v38 = vld [vmem:[%s2364_s0] sm:$0xff]  ;;  %v616_v39 = vrot.slane %v1797_v16, %v1850_v34  ;;  %v1881_v44 = vsub.s32 5, %v1777_v9  ;;  %v1887_v46 = vsub.s32 6, %v1777_v9  ;;  %vm775_vm2 = vcmask 130112  }
   0xf   :  { %589 = vbcast.lane.b32.xlu1 %v583_v22, 264  ;;  %585 = vbcast.lane.b32.xlu0 %v583_v22, 256  ;;  %v60_v37 = vld [vmem:[%s2365_s1 + $0x38] sm:$0xff]  ;;  %v61_v41 = vld [vmem:[%s2365_s1 + $0x40] sm:$0xff]  ;;  %v62_v42 = vld [vmem:[%s2365_s1 + $0x48] sm:$0xff]  ;;  %v627_v43 = vrot.slane %v1797_v16, %v1867_v40  ;;  %vm840_vm3 = vcmask 1041409  }
  0x10   :  { %1531 = vmatmul.mubr.msk.f32.gmra.mrb[2].mxu0 %vm80_vm0, %v56_v24  ;;  %1546 = vmatmul.mubr.msk.f32.gmra.mrb[2].mxu1 %vm80_vm0, %v66_v25  ;;  %v638_v45 = vrot.slane %v1797_v16, %v1881_v44  ;;  %v649_v47 = vrot.slane %v1797_v16, %v1887_v46  ;;  %v1475_v48 = vld [vmem:[%s2369_s5] ss:$0 sm:$0xff]  ;;  %v1707_v55 = vmov 1966171168   ;;  %vm842_vm4 = vcmask 1042434   ;;  %s1457_s14 = sshll.u32 %s1709_s13, 4  ;;  %s1458_s14 = int_to_ptr.vmem [resolvable:$true] %s1457_s14 }
  0x11   :  { %1533 = vmatprep.mubr.msk.f32.mxu0 %vm80_vm0, %v57_v27  ;;  %1548 = vmatprep.mubr.msk.f32.mxu1 %vm80_vm0, %v67_v28  ;;  %v389_v56 = vunpack.c.l.s4 %v1707_v55  ;;  %vm844_vm5 = vcmask 1043459   ;;  %vm846_vm6 = vcmask 1044484   ;;  %vm848_vm7 = vcmask 1045509   ;;  %p1661_p1 = scmp.lt.s32.totalorder %s1458_s14, %s1458_s14 }
  0x12   :  { %1575 = vmatpush3.bf16.msra.mxu1 %v1574_v29  ;;  %vm850_vm8 = vcmask 1046534   ;;  %vm852_vm9 = vcmask 1047559   ;;  %vm855_vm10 = vcmask 130048  }
  0x13   :  { %596 = vbcast.lane.b32.xlu1 %v594_v30, 256  ;;  %607 = vbcast.lane.b32.xlu0 %v605_v33, 256  ;;  %v390_v1 = vunpack.c.0.s8 %v389_v56 }
  0x14   :  { %1534 = vmatmul.mubr.msk.f32.gmra.mrb[4].mxu0 %vm80_vm0, %v58_v31  ;;  %1549 = vmatmul.mubr.msk.f32.gmra.mrb[4].mxu1 %vm80_vm0, %v68_v32 }
  0x15   :  { %1536 = vmatprep.mubr.msk.f32.mxu0 %vm80_vm0, %v59_v35  ;;  %1559 = vmatprep.mubr.msk.f32.mxu1 %vm1705_vm1, %v1706_v36  ;;  %v393_v13 = vsub.s32 %v390_v1, %v1777_v9 }
  0x17   :  { %600 = vbcast.lane.b32.xlu1 %v594_v30, 264  ;;  %618 = vbcast.lane.b32.xlu0 %v616_v39, 256 }
  0x18   :  { %1537 = vmatmul.mubr.msk.f32.gmra.mrb[6].mxu0 %vm80_vm0, %v60_v37  ;;  %1560 = vmatmul.mubr.msk.f32.vlgmr.msra.gmra.mrb[6].mxu1 %vm80_vm0, %v290_v38 }
  0x19   :  { %1539 = vmatprep.mubr.msk.f32.mxu0 %vm80_vm0, %v61_v41 }
  0x1b   :  { %611 = vbcast.lane.b32.xlu1 %v605_v33, 264  ;;  %629 = vbcast.lane.b32.xlu0 %v627_v43, 256 }
  0x1c   :  { %1540 = vmatmul.mubr.msk.f32.gmra.mrb[8].mxu0 %vm80_vm0, %v62_v42 }
  0x1f   :  { %622 = vbcast.lane.b32.xlu1 %v616_v39, 264  ;;  %640 = vbcast.lane.b32.xlu0 %v638_v45, 256 }
  0x23   :  { %633 = vbcast.lane.b32.xlu1 %v627_v43, 264  ;;  %651 = vbcast.lane.b32.xlu0 %v649_v47, 256 }
  0x27   :  { %644 = vbcast.lane.b32.xlu1 %v638_v45, 264 }
  0x2b   :  { %655 = vbcast.lane.b32.xlu1 %v649_v47, 264 }
  0xdf   :  { %v1544_v49 = vpop.f32.mrb[0].mxu1  ;;  %v1529_v50 = vpop.f32.mrb[0].mxu0 }
  0xe0   :  { %v251_v51 = vadd.f32 %v1544_v49, %v1475_v48  ;;  %v245_v52 = vpop.f32.mrb[1].mxu1  ;;  %v201_v53 = vadd.f32 %v1529_v50, %v1475_v48  ;;  %v195_v54 = vpop.f32.mrb[1].mxu0 }
  0xe1   :  { %v246_v57 = vadd.f32 %v1475_v48, %v245_v52  ;;  %v196_v58 = vadd.f32 %v1475_v48, %v195_v54 }
  0xe2   :  { %285 = vst.msk [vmem:[#allocation2 + $0x58] sm:$0xff] %vm80_vm0, %v251_v51  ;;  %275 = vst.msk [vmem:[#allocation2 + $0x8] sm:$0xff] %vm80_vm0, %v201_v53 }
  0xe3   :  { %284 = vst.msk [vmem:[#allocation2 + $0x50] sm:$0xff] %vm80_vm0, %v246_v57  ;;  %v1547_v59 = vpop.f32.mrb[2].mxu1  ;;  %274 = vst.msk [vmem:[#allocation2] sm:$0xff] %vm80_vm0, %v196_v58  ;;  %v1532_v60 = vpop.f32.mrb[2].mxu0 }
  0xe4   :  { %v261_v61 = vadd.f32 %v1547_v59, %v1475_v48  ;;  %v255_v62 = vpop.f32.mrb[3].mxu1  ;;  %v211_v63 = vadd.f32 %v1532_v60, %v1475_v48  ;;  %v205_v0 = vpop.f32.mrb[3].mxu0 }
  0xe5   :  { %v256_v2 = vadd.f32 %v1475_v48, %v255_v62  ;;  %v206_v4 = vadd.f32 %v1475_v48, %v205_v0 }
  0xe6   :  { %287 = vst.msk [vmem:[#allocation2 + $0x68] sm:$0xff] %vm80_vm0, %v261_v61  ;;  %277 = vst.msk [vmem:[#allocation2 + $0x18] sm:$0xff] %vm80_vm0, %v211_v63 }
  0xe7   :  { %286 = vst.msk [vmem:[#allocation2 + $0x60] sm:$0xff] %vm80_vm0, %v256_v2  ;;  %v1550_v5 = vpop.f32.mrb[4].mxu1  ;;  %276 = vst.msk [vmem:[#allocation2 + $0x10] sm:$0xff] %vm80_vm0, %v206_v4  ;;  %v1535_v6 = vpop.f32.mrb[4].mxu0 }
  0xe8   :  { %v271_v7 = vadd.f32 %v1550_v5, %v1475_v48  ;;  %v265_v8 = vpop.f32.mrb[5].mxu1  ;;  %v221_v10 = vadd.f32 %v1535_v6, %v1475_v48  ;;  %v215_v11 = vpop.f32.mrb[5].mxu0 }
  0xe9   :  { %v266_v14 = vadd.f32 %v1475_v48, %v265_v8  ;;  %v216_v15 = vadd.f32 %v1475_v48, %v215_v11  ;;  %v370_v43 = vld [vmem:[#allocation2 + $0x8] sm:$0xff]  ;;  %v380_v8 = vld [vmem:[#allocation2 + $0x58] sm:$0xff] }
  0xea   :  { %289 = vst.msk [vmem:[#allocation2 + $0x78] sm:$0xff] %vm80_vm0, %v271_v7  ;;  %279 = vst.msk [vmem:[#allocation2 + $0x28] sm:$0xff] %vm80_vm0, %v221_v10  ;;  %v369_v39 = vld [vmem:[#allocation2] sm:$0xff]  ;;  %v379_v63 = vld [vmem:[#allocation2 + $0x50] sm:$0xff] }
  0xeb   :  { %288 = vst.msk [vmem:[#allocation2 + $0x70] sm:$0xff] %vm80_vm0, %v266_v14  ;;  %278 = vst.msk [vmem:[#allocation2 + $0x20] sm:$0xff] %vm80_vm0, %v216_v15  ;;  %v1538_v17 = vpop.f32.mrb[6].mxu0  ;;  %v365_v18 = vpop.f32.mrb[6].mxu1  ;;  %v1924_v7 = vld [vmem:[%s2370_s6] ss:$0 sm:$0xff] }
  0xec   :  { %v231_v19 = vadd.f32 %v1538_v17, %v1475_v48  ;;  %v387_v20 = vcombine.high %v365_v18, %v365_v18  ;;  %v394_v21 = vrot.slane %v365_v18, %v393_v13  ;;  %v225_v22 = vpop.f32.mrb[7].mxu0  ;;  %v1561_v24 = vpop.f32.mrb[7].mxu1 }
  0xed   :  { %v226_v25 = vadd.f32 %v1475_v48, %v225_v22  ;;  %v372_v45 = vld [vmem:[#allocation2 + $0x18] sm:$0xff] }
  0xee   :  { %281 = vst.msk [vmem:[#allocation2 + $0x38] sm:$0xff] %vm80_vm0, %v231_v19  ;;  %v401_v27 = vrot.slane %v387_v20, %v393_v13  ;;  %v402_v28 = vcombine.high %v394_v21, %v394_v21  ;;  %v410_v29 = vrot.slane %v394_v21, %v393_v13  ;;  %v371_v41 = vld [vmem:[#allocation2 + $0x10] sm:$0xff]  ;;  %v381_v4 = vld [vmem:[#allocation2 + $0x60] sm:$0xff]  ;;  %v382_v21 = vld [vmem:[#allocation2 + $0x68] sm:$0xff] }
  0xef   :  { %280 = vst.msk [vmem:[#allocation2 + $0x30] sm:$0xff] %vm80_vm0, %v226_v25  ;;  %v1541_v30 = vpop.f32.mrb[8].mxu0 }
  0xf0   :  { %v403_v31 = vcombine.high %v401_v27, %v401_v27  ;;  %v424_v32 = vrot.slane %v402_v28, %v393_v13  ;;  %v432_v33 = vcombine.high %v410_v29, %v410_v29  ;;  %v235_v35 = vpop.f32.mrb[9].mxu0  ;;  %v439_v36 = vrot.slane %v410_v29, %v1786_v12 }
  0xf1   :  { %v241_v37 = vadd.f32 %v1541_v30, %v1475_v48  ;;  %v236_v38 = vadd.f32 %v1475_v48, %v235_v35  ;;  %v1911_v47 = vrot.slane %v401_v27, %v393_v13  ;;  %v374_v55 = vld [vmem:[#allocation2 + $0x28] sm:$0xff]  ;;  %v384_v35 = vld [vmem:[#allocation2 + $0x78] sm:$0xff] }
  0xf2   :  { %v443_v42 = vrot.slane %v424_v32, %v1786_v12  ;;  %v431_v49 = vrot.slane %v403_v31, %v393_v13  ;;  %v447_v50 = vrot.slane %v432_v33, %v1786_v12  ;;  %v476_v51 = vadd.f32 %v439_v36, %v369_v39  ;;  %v373_v52 = vld [vmem:[#allocation2 + $0x20] sm:$0xff]  ;;  %v383_v29 = vld [vmem:[#allocation2 + $0x70] sm:$0xff] }
  0xf3   :  { %283 = vst.msk [vmem:[#allocation2 + $0x48] sm:$0xff] %vm80_vm0, %v241_v37  ;;  %282 = vst.msk [vmem:[#allocation2 + $0x40] sm:$0xff] %vm80_vm0, %v236_v38  ;;  %v477_v53 = vadd.f32 %v439_v36, %v370_v43  ;;  %v434_v54 = vcombine.high %v424_v32, %v424_v32  ;;  %v433_v57 = vcombine.high %v1911_v47, %v1911_v47 }
  0xf4   :  { %v478_v48 = vadd.f32 %v443_v42, %v371_v41  ;;  %v479_v56 = vadd.f32 %v443_v42, %v372_v45  ;;  %v459_v58 = vrot.slane %v431_v49, %v1786_v12  ;;  %v480_v59 = vadd.f32 %v447_v50, %v373_v52 }
  0xf5   :  { %1589 = vtanh.f32 %v476_v51  ;;  %v451_v60 = vrot.slane %v434_v54, %v1786_v12  ;;  %v481_v61 = vadd.f32 %v447_v50, %v374_v55  ;;  %v376_v62 = vld [vmem:[#allocation2 + $0x38] sm:$0xff]  ;;  %v463_v0 = vrot.slane %v433_v57, %v1786_v12 }
  0xf6   :  { %1591 = vtanh.f32 %v477_v53  ;;  %v486_v1 = vadd.f32 %v459_v58, %v379_v63  ;;  %v435_v5 = vcombine.high %v431_v49, %v431_v49  ;;  %v375_v10 = vld [vmem:[#allocation2 + $0x30] sm:$0xff]  ;;  %v487_v13 = vadd.f32 %v459_v58, %v380_v8 }
  0xf7   :  { %1593 = vtanh.f32 %v478_v48  ;;  %v483_v2 = vadd.f32 %v451_v60, %v376_v62  ;;  %v488_v6 = vadd.f32 %v463_v0, %v381_v4  ;;  %v482_v19 = vadd.f32 %v451_v60, %v375_v10 }
  0xf8   :  { %1595 = vtanh.f32 %v479_v56  ;;  %v467_v18 = vrot.slane %v435_v5, %v1786_v12  ;;  %v489_v28 = vadd.f32 %v463_v0, %v382_v21  ;;  %v455_v41 = vrot.slane %v1911_v47, %v1786_v12 }
  0xf9   :  { %1597 = vtanh.f32 %v480_v59 }
  0xfa   :  { %1599 = vtanh.f32 %v481_v61  ;;  %v490_v33 = vadd.f32 %v467_v18, %v383_v29  ;;  %v377_v38 = vld [vmem:[#allocation2 + $0x40] sm:$0xff]  ;;  %v491_v42 = vadd.f32 %v467_v18, %v384_v35  ;;  %v378_v49 = vld [vmem:[#allocation2 + $0x48] sm:$0xff]  ;;  %v586_v29 = vpop.permute.xlu0 %585 }
  0xfb   :  { %1601 = vtanh.f32 %v486_v1  ;;  %v484_v51 = vadd.f32 %v455_v41, %v377_v38  ;;  %v485_v47 = vadd.f32 %v455_v41, %v378_v49  ;;  %v1708_v1 = vmov 0  }
  0xfc   :  { %1603 = vtanh.f32 %v483_v2  ;;  %1587 = vset.pattern.permute.xlu0 %v1708_v1  ;;  %1588 = vset.pattern.permute.xlu1 %v1708_v1 }
  0xfd   :  { %1605 = vtanh.f32 %v488_v6 }
  0xfe   :  { %1607 = vtanh.f32 %v487_v13 }
  0xff   :  { %v1590_v11 = vpop.eup %1589  ;;  %1609 = vtanh.f32 %v482_v19 }
 0x100   :  { %v1592_v14 = vpop.eup %1591  ;;  %v514_v15 = vmul.f32 %v1590_v11, %v1924_v7  ;;  %1611 = vtanh.f32 %v489_v28 }
 0x101   :  { %v1594_v17 = vpop.eup %1593  ;;  %v515_v25 = vmul.f32 %v1592_v14, %v1924_v7  ;;  %1613 = vtanh.f32 %v490_v33 }
 0x102   :  { %v1596_v20 = vpop.eup %1595  ;;  %v530_v22 = vsel %vm80_vm0, %v514_v15, 0.0  ;;  %v516_v24 = vmul.f32 %v1594_v17, %v1924_v7  ;;  %1615 = vtanh.f32 %v491_v42 }
 0x103   :  { %v1598_v27 = vpop.eup %1597  ;;  %531 = vadd.xlane.f32.xlu0 %v530_v22  ;;  %v517_v31 = vmul.f32 %v1596_v20, %v1924_v7  ;;  %v533_v36 = vsel %vm80_vm0, %v515_v25, 0.0  ;;  %1617 = vtanh.f32 %v484_v51 }
 0x104   :  { %v536_v30 = vsel %vm80_vm0, %v516_v24, 0.0  ;;  %v1600_v32 = vpop.eup %1599  ;;  %v518_v37 = vmul.f32 %v1598_v27, %v1924_v7  ;;  %1619 = vtanh.f32 %v485_v47  ;;  %v1962_v24 = vsub.s32 7, %v1777_v9  ;;  %v590_v27 = vpop.permute.xlu1 %589 }
 0x105   :  { %537 = vadd.xlane.f32.xlu1 %v536_v30  ;;  %v1602_v39 = vpop.eup %1601  ;;  %v539_v43 = vsel %vm80_vm0, %v517_v31, 0.0  ;;  %v519_v45 = vmul.f32 %v1600_v32, %v1924_v7 }
 0x106   :  { %v1604_v50 = vpop.eup %1603  ;;  %v542_v52 = vsel %vm80_vm0, %v518_v37, 0.0  ;;  %v524_v53 = vmul.f32 %v1602_v39, %v1924_v7  ;;  %v660_v25 = vrot.slane %v1797_v16, %v1962_v24 }
 0x107   :  { %534 = vadd.xlane.f32.xlu0 %v533_v36  ;;  %v1606_v54 = vpop.eup %1605  ;;  %v545_v48 = vsel %vm80_vm0, %v519_v45, 0.0  ;;  %v521_v55 = vmul.f32 %v1604_v50, %v1924_v7 }
 0x108   :  { %v1608_v56 = vpop.eup %1607  ;;  %v560_v57 = vsel %vm80_vm0, %v524_v53, 0.0  ;;  %v526_v58 = vmul.f32 %v1606_v54, %v1924_v7  ;;  %v597_v28 = vpop.permute.xlu1 %596 }
 0x109   :  { %540 = vadd.xlane.f32.xlu1 %v539_v43  ;;  %v1610_v59 = vpop.eup %1609  ;;  %v551_v60 = vsel %vm80_vm0, %v521_v55, 0.0  ;;  %v525_v61 = vmul.f32 %v1608_v56, %v1924_v7 }
 0x10a   :  { %v1612_v62 = vpop.eup %1611  ;;  %v566_v63 = vsel %vm80_vm0, %v526_v58, 0.0  ;;  %v520_v0 = vmul.f32 %v1610_v59, %v1924_v7 }
 0x10b   :  { %543 = vadd.xlane.f32.xlu0 %v542_v52  ;;  %v1614_v2 = vpop.eup %1613  ;;  %v563_v4 = vsel %vm80_vm0, %v525_v61, 0.0  ;;  %v527_v5 = vmul.f32 %v1612_v62, %v1924_v7 }
 0x10c   :  { %v1616_v6 = vpop.eup %1615  ;;  %v548_v8 = vsel %vm80_vm0, %v520_v0, 0.0  ;;  %v528_v10 = vmul.f32 %v1614_v2, %v1924_v7  ;;  %v601_v30 = vpop.permute.xlu1 %600 }
 0x10d   :  { %546 = vadd.xlane.f32.xlu1 %v545_v48  ;;  %v1618_v11 = vpop.eup %1617  ;;  %v569_v13 = vsel %vm80_vm0, %v527_v5, 0.0  ;;  %v529_v14 = vmul.f32 %v1616_v6, %v1924_v7 }
 0x10e   :  { %v1620_v15 = vpop.eup %1619  ;;  %v572_v17 = vsel %vm80_vm0, %v528_v10, 0.0  ;;  %v522_v18 = vmul.f32 %v1618_v11, %v1924_v7 }
 0x10f   :  { %561 = vadd.xlane.f32.xlu0 %v560_v57  ;;  %v575_v19 = vsel %vm80_vm0, %v529_v14, 0.0  ;;  %v523_v20 = vmul.f32 %v1620_v15, %v1924_v7  ;;  %v608_v7 = vpop.permute.xlu0 %607 }
 0x110   :  { %v554_v21 = vsel %vm80_vm0, %v522_v18, 0.0  ;;  %v612_v31 = vpop.permute.xlu1 %611 }
 0x111   :  { %552 = vadd.xlane.f32.xlu1 %v551_v60  ;;  %v557_v22 = vsel %vm80_vm0, %v523_v20, 0.0 }
 0x113   :  { %567 = vadd.xlane.f32.xlu0 %v566_v63  ;;  %v619_v32 = vpop.permute.xlu0 %618 }
 0x114   :  { %v623_v33 = vpop.permute.xlu1 %622 }
 0x115   :  { %564 = vadd.xlane.f32.xlu1 %v563_v4 }
 0x117   :  { %549 = vadd.xlane.f32.xlu0 %v548_v8  ;;  %v630_v35 = vpop.permute.xlu0 %629 }
 0x118   :  { %v634_v36 = vpop.permute.xlu1 %633 }
 0x119   :  { %570 = vadd.xlane.f32.xlu1 %v569_v13 }
 0x11b   :  { %573 = vadd.xlane.f32.xlu0 %v572_v17  ;;  %v641_v37 = vpop.permute.xlu0 %640 }
 0x11c   :  { %v645_v38 = vpop.permute.xlu1 %644 }
 0x11d   :  { %576 = vadd.xlane.f32.xlu1 %v575_v19 }
 0x11f   :  { %555 = vadd.xlane.f32.xlu0 %v554_v21  ;;  %v652_v39 = vpop.permute.xlu0 %651 }
 0x120   :  { %v656_v41 = vpop.permute.xlu1 %655 }
 0x121   :  { %558 = vadd.xlane.f32.xlu1 %v557_v22 }
 0x132   :  { %666 = vbcast.lane.b32.xlu1 %v660_v25, 264 }
 0x135   :  { %662 = vbcast.lane.b32.xlu0 %v660_v25, 256 }
 0x190   :  { %v532_v42 = vpop.xlane.xlu0 %531 }
 0x191   :  { %v1966_v43 = vadd.f32 %v586_v29, %v532_v42 }
 0x192   :  { %v538_v16 = vpop.xlane.xlu1 %537 }
 0x193   :  { %717 = vperm.xlu0 %1587, %v1966_v43   ;;  %v1974_v53 = vadd.f32 %v597_v28, %v538_v16  ;;  %v765_v28 = vand.u32 127, %v391_v3 }
 0x194   :  { %v535_v45 = vpop.xlane.xlu0 %534 }
 0x195   :  { %v1969_v49 = vadd.f32 %v590_v27, %v535_v45 }
 0x196   :  { %v541_v50 = vpop.xlane.xlu1 %540 }
 0x197   :  { %v1971_v51 = vadd.f32 %v601_v30, %v541_v50  ;;  %720 = vperm.xlu1 %1588, %v1969_v49   ;;  %v770_v30 = vadd.s32 4294967288, %v765_v28 }
 0x198   :  { %v544_v52 = vpop.xlane.xlu0 %543 }
 0x199   :  { %726 = vperm.xlu0 %1587, %v1971_v51   ;;  %v1980_v55 = vadd.f32 %v608_v7, %v544_v52 }
 0x19a   :  { %v547_v54 = vpop.xlane.xlu1 %546 }
 0x19b   :  { %v1977_v47 = vadd.f32 %v612_v31, %v547_v54  ;;  %723 = vperm.xlu1 %1588, %v1974_v53  }
 0x19c   :  { %v562_v48 = vpop.xlane.xlu0 %561 }
 0x19d   :  { %732 = vperm.xlu0 %1587, %v1977_v47   ;;  %v1986_v59 = vadd.f32 %v641_v37, %v562_v48 }
 0x19e   :  { %v553_v56 = vpop.xlane.xlu1 %552 }
 0x19f   :  { %v1983_v57 = vadd.f32 %v623_v33, %v553_v56  ;;  %729 = vperm.xlu1 %1588, %v1980_v55   ;;  %v2019_v33 = vsub.s32 %v770_v30, %v1777_v9 }
 0x1a0   :  { %v568_v58 = vpop.xlane.xlu0 %567 }
 0x1a1   :  { %738 = vperm.xlu0 %1587, %v1983_v57   ;;  %v1992_v63 = vadd.f32 %v652_v39, %v568_v58 }
 0x1a2   :  { %v565_v60 = vpop.xlane.xlu1 %564 }
 0x1a3   :  { %v1989_v61 = vadd.f32 %v645_v38, %v565_v60  ;;  %747 = vperm.xlu1 %1588, %v1986_v59  }
 0x1a4   :  { %v550_v62 = vpop.xlane.xlu0 %549 }
 0x1a5   :  { %750 = vperm.xlu0 %1587, %v1989_v61   ;;  %v1998_v4 = vadd.f32 %v619_v32, %v550_v62  ;;  %v2016_v32 = vsub.s32 %v765_v28, %v1777_v9 }
 0x1a6   :  { %v571_v0 = vpop.xlane.xlu1 %570 }
 0x1a7   :  { %v1995_v1 = vadd.f32 %v656_v41, %v571_v0  ;;  %753 = vperm.xlu1 %1588, %v1992_v63  }
 0x1a8   :  { %v574_v2 = vpop.xlane.xlu0 %573 }
 0x1a9   :  { %756 = vperm.xlu0 %1587, %v1995_v1  }
 0x1aa   :  { %v577_v5 = vpop.xlane.xlu1 %576 }
 0x1ab   :  { %735 = vperm.xlu1 %1588, %v1998_v4  }
 0x1ac   :  { %v556_v6 = vpop.xlane.xlu0 %555 }
 0x1ad   :  { %v2002_v8 = vadd.f32 %v630_v35, %v556_v6 }
 0x1ae   :  { %v559_v10 = vpop.xlane.xlu1 %558 }
 0x1af   :  { %v2004_v11 = vadd.f32 %v634_v36, %v559_v10  ;;  %741 = vperm.xlu1 %1588, %v2002_v8  }
 0x1b0   :  { %v663_v13 = vpop.permute.xlu0 %662 }
 0x1b1   :  { %v2007_v14 = vadd.f32 %v663_v13, %v574_v2  ;;  %744 = vperm.xlu0 %1587, %v2004_v11  }
 0x1b2   :  { %v667_v15 = vpop.permute.xlu1 %666 }
 0x1b3   :  { %v2010_v17 = vadd.f32 %v667_v15, %v577_v5  ;;  %759 = vperm.xlu1 %1588, %v2007_v14  }
 0x1b5   :  { %762 = vperm.xlu0 %1587, %v2010_v17  }
 0x212   :  { %v718_v18 = vpop.permute.xlu0 %717 }
 0x213   :  { %v769_v16 = vrot.slane %v718_v18, %v2016_v32 }
 0x216   :  { %v721_v19 = vpop.permute.xlu1 %720 }
 0x217   :  { %v774_v38 = vrot.slane %v721_v19, %v2019_v33 }
 0x218   :  { %v727_v20 = vpop.permute.xlu0 %726 }
 0x219   :  { %v784_v39 = vrot.slane %v727_v20, %v2019_v33  ;;  %v776_v54 = vsel %vm775_vm2, %v774_v38, %v769_v16 }
 0x21a   :  { %v724_v21 = vpop.permute.xlu1 %723 }
 0x21b   :  { %v780_v35 = vrot.slane %v724_v21, %v2016_v32 }
 0x21c   :  { %v733_v22 = vpop.permute.xlu0 %732 }
 0x21d   :  { %v793_v42 = vrot.slane %v733_v22, %v2019_v33  ;;  %v785_v9 = vsel %vm775_vm2, %v784_v39, %v780_v35 }
 0x21e   :  { %v730_v25 = vpop.permute.xlu1 %729  ;;  %v841_v60 = vsel %vm840_vm3, %v785_v9, %v776_v54 }
 0x21f   :  { %v789_v37 = vrot.slane %v730_v25, %v2016_v32 }
 0x220   :  { %v739_v27 = vpop.permute.xlu0 %738 }
 0x221   :  { %v802_v45 = vrot.slane %v739_v27, %v2019_v33  ;;  %v794_v52 = vsel %vm775_vm2, %v793_v42, %v789_v37 }
 0x222   :  { %v748_v29 = vpop.permute.xlu1 %747  ;;  %v843_v5 = vsel %vm842_vm4, %v794_v52, %v841_v60 }
 0x223   :  { %v816_v6 = vrot.slane %v748_v29, %v2016_v32 }
 0x224   :  { %v751_v7 = vpop.permute.xlu0 %750 }
 0x225   :  { %v820_v48 = vrot.slane %v751_v7, %v2019_v33 }
 0x226   :  { %v754_v31 = vpop.permute.xlu1 %753 }
 0x227   :  { %v825_v13 = vrot.slane %v754_v31, %v2016_v32  ;;  %v821_v19 = vsel %vm775_vm2, %v820_v48, %v816_v6 }
 0x228   :  { %v757_v3 = vpop.permute.xlu0 %756 }
 0x229   :  { %v829_v62 = vrot.slane %v757_v3, %v2019_v33 }
 0x22a   :  { %v736_v36 = vpop.permute.xlu1 %735 }
 0x22b   :  { %v798_v41 = vrot.slane %v736_v36, %v2016_v32  ;;  %v830_v22 = vsel %vm775_vm2, %v829_v62, %v825_v13 }
 0x22d   :  { %v803_v56 = vsel %vm775_vm2, %v802_v45, %v798_v41 }
 0x22e   :  { %v742_v50 = vpop.permute.xlu1 %741  ;;  %v845_v15 = vsel %vm844_vm5, %v803_v56, %v843_v5 }
 0x22f   :  { %v807_v0 = vrot.slane %v742_v50, %v2016_v32 }
 0x230   :  { %v745_v58 = vpop.permute.xlu0 %744 }
 0x231   :  { %v811_v2 = vrot.slane %v745_v58, %v2019_v33 }
 0x232   :  { %v760_v10 = vpop.permute.xlu1 %759 }
 0x233   :  { %v812_v18 = vsel %vm775_vm2, %v811_v2, %v807_v0  ;;  %v834_v25 = vrot.slane %v760_v10, %v2016_v32 }
 0x234   :  { %v847_v20 = vsel %vm846_vm6, %v812_v18, %v845_v15  ;;  %v763_v21 = vpop.permute.xlu0 %762 }
 0x235   :  { %v838_v27 = vrot.slane %v763_v21, %v2019_v33  ;;  %v849_v28 = vsel %vm848_vm7, %v821_v19, %v847_v20 }
 0x236   :  { %v851_v29 = vsel %vm850_vm8, %v830_v22, %v849_v28 }
 0x237   :  { %v839_v30 = vsel %vm775_vm2, %v838_v27, %v834_v25 }
 0x238   :  { %v853_v7 = vsel %vm852_vm9, %v839_v30, %v851_v29 }
 0x239   :  { %v856_v31 = vsel %vm855_vm10, %v853_v7, -inf }
 0x23a   :  { %857 = vmax.xlane.f32.xlu1 %v856_v31 }
 0x2c7   :  { %v858_v35 = vpop.xlane.xlu1 %857 }
 0x2c8   :  { %v863_v36 = vrot.slane %v858_v35, %v1786_v12  ;;  %v867_v38 = vrot.slane %v858_v35, %v1814_v23  ;;  %v879_v3 = vrot.slane %v858_v35, %v1867_v40  ;;  %v2061_v45 = vrot.slane %v858_v35, %v1962_v24 }
 0x2c9   :  { %v871_v50 = vrot.slane %v858_v35, %v1826_v26  ;;  %v875_v58 = vrot.slane %v858_v35, %v1850_v34 }
 0x2ca   :  { %v900_v37 = vsub.f32 %v1966_v43, %v863_v36  ;;  %v901_v39 = vsub.f32 %v1969_v49, %v863_v36  ;;  %v902_v42 = vsub.f32 %v1974_v53, %v867_v38  ;;  %v909_v9 = vsub.f32 %v2004_v11, %v879_v3 }
 0x2cb   :  { %v903_v43 = vsub.f32 %v1971_v51, %v867_v38  ;;  %v915_v49 = vsub.f32 %v2010_v17, %v2061_v45  ;;  %v904_v48 = vsub.f32 %v1980_v55, %v871_v50  ;;  %v905_v51 = vsub.f32 %v1977_v47, %v871_v50 }
 0x2cc   :  { %v916_v41 = vmul.f32 1.442695, %v900_v37  ;;  %v918_v16 = vmul.f32 1.442695, %v901_v39  ;;  %v920_v52 = vmul.f32 1.442695, %v902_v42  ;;  %v906_v55 = vsub.f32 %v1998_v4, %v875_v58 }
 0x2cd   :  { %v934_v54 = vmul.f32 1.442695, %v909_v9  ;;  %v922_v53 = vmul.f32 1.442695, %v903_v43  ;;  %v946_v11 = vmul.f32 1.442695, %v915_v49  ;;  %v907_v5 = vsub.f32 %v1983_v57, %v875_v58 }
 0x2ce   :  { %1621 = vpow2.f32 %v916_v41  ;;  %v924_v60 = vmul.f32 1.442695, %v904_v48  ;;  %v926_v17 = vmul.f32 1.442695, %v905_v51  ;;  %v928_v47 = vmul.f32 1.442695, %v906_v55 }
 0x2cf   :  { %1623 = vpow2.f32 %v918_v16  ;;  %v883_v4 = vrot.slane %v858_v35, %v1881_v44  ;;  %v908_v10 = vsub.f32 %v2002_v8, %v879_v3  ;;  %v930_v13 = vmul.f32 1.442695, %v907_v5 }
 0x2d0   :  { %1625 = vpow2.f32 %v920_v52  ;;  %v887_v8 = vrot.slane %v858_v35, %v1887_v46 }
 0x2d1   :  { %1627 = vpow2.f32 %v934_v54  ;;  %v910_v57 = vsub.f32 %v1986_v59, %v883_v4  ;;  %v932_v19 = vmul.f32 1.442695, %v908_v10  ;;  %v911_v21 = vsub.f32 %v1989_v61, %v883_v4 }
 0x2d2   :  { %1629 = vpow2.f32 %v922_v53  ;;  %v912_v27 = vsub.f32 %v1992_v63, %v887_v8  ;;  %v913_v29 = vsub.f32 %v1995_v1, %v887_v8  ;;  %v914_v61 = vsub.f32 %v2007_v14, %v2061_v45 }
 0x2d3   :  { %1631 = vpow2.f32 %v946_v11  ;;  %v936_v22 = vmul.f32 1.442695, %v910_v57  ;;  %v938_v59 = vmul.f32 1.442695, %v911_v21 }
 0x2d4   :  { %1633 = vpow2.f32 %v924_v60  ;;  %v940_v30 = vmul.f32 1.442695, %v912_v27  ;;  %v942_v31 = vmul.f32 1.442695, %v913_v29  ;;  %v944_v35 = vmul.f32 1.442695, %v914_v61 }
 0x2d5   :  { %1635 = vpow2.f32 %v926_v17 }
 0x2d6   :  { %1637 = vpow2.f32 %v928_v47 }
 0x2d7   :  { %1639 = vpow2.f32 %v930_v13 }
 0x2d8   :  { %v2068_v56 = vpop.eup %1621  ;;  %1641 = vpow2.f32 %v932_v19 }
 0x2d9   :  { %965 = vperm.xlu0 %1587, %v2068_v56   ;;  %v2073_v62 = vpop.eup %1623  ;;  %1643 = vpow2.f32 %v936_v22 }
 0x2da   :  { %v2077_v0 = vpop.eup %1625  ;;  %1645 = vpow2.f32 %v938_v59 }
 0x2db   :  { %v2079_v2 = vpop.eup %1627  ;;  %1647 = vpow2.f32 %v940_v30 }
 0x2dc   :  { %992 = vperm.xlu1 %1588, %v2079_v2   ;;  %v2084_v6 = vpop.eup %1629  ;;  %1649 = vpow2.f32 %v942_v31 }
 0x2dd   :  { %968 = vperm.xlu0 %1587, %v2073_v62   ;;  %v2089_v15 = vpop.eup %1631  ;;  %1651 = vpow2.f32 %v944_v35 }
 0x2de   :  { %v2091_v18 = vpop.eup %1633 }
 0x2df   :  { %v2096_v20 = vpop.eup %1635 }
 0x2e0   :  { %1010 = vperm.xlu1 %1588, %v2089_v15   ;;  %v2101_v25 = vpop.eup %1637 }
 0x2e1   :  { %971 = vperm.xlu0 %1587, %v2077_v0   ;;  %v2105_v28 = vpop.eup %1639 }
 0x2e2   :  { %v2109_v7 = vpop.eup %1641 }
 0x2e3   :  { %v2114_v63 = vpop.eup %1643 }
 0x2e4   :  { %v2117_v36 = vpop.eup %1645 }
 0x2e5   :  { %974 = vperm.xlu0 %1587, %v2084_v6   ;;  %v2120_v1 = vpop.eup %1647 }
 0x2e6   :  { %v2123_v37 = vpop.eup %1649 }
 0x2e7   :  { %v2126_v14 = vpop.eup %1651 }
 0x2e9   :  { %977 = vperm.xlu0 %1587, %v2091_v18  }
 0x2ed   :  { %980 = vperm.xlu0 %1587, %v2096_v20  }
 0x2f1   :  { %983 = vperm.xlu0 %1587, %v2101_v25  }
 0x2f5   :  { %986 = vperm.xlu0 %1587, %v2105_v28  }
 0x2f9   :  { %989 = vperm.xlu0 %1587, %v2109_v7  }
 0x2fd   :  { %995 = vperm.xlu0 %1587, %v2114_v63  }
 0x301   :  { %998 = vperm.xlu0 %1587, %v2117_v36  }
 0x305   :  { %1001 = vperm.xlu0 %1587, %v2120_v1  }
 0x309   :  { %1004 = vperm.xlu0 %1587, %v2123_v37  }
 0x30d   :  { %1007 = vperm.xlu0 %1587, %v2126_v14  }
 0x358   :  { %v966_v38 = vpop.permute.xlu0 %965 }
 0x359   :  { %v1015_v17 = vrot.slane %v966_v38, %v2016_v32 }
 0x35b   :  { %v993_v49 = vpop.permute.xlu1 %992 }
 0x35c   :  { %v969_v39 = vpop.permute.xlu0 %968  ;;  %v1055_v10 = vrot.slane %v993_v49, %v2019_v33 }
 0x35d   :  { %v1019_v11 = vrot.slane %v969_v39, %v2019_v33 }
 0x35f   :  { %v1020_v19 = vsel %vm775_vm2, %v1019_v11, %v1015_v17  ;;  %v1011_v27 = vpop.permute.xlu1 %1010 }
 0x360   :  { %v972_v3 = vpop.permute.xlu0 %971 }
 0x361   :  { %v1024_v58 = vrot.slane %v972_v3, %v2016_v32  ;;  %v1082_v3 = vrot.slane %v1011_v27, %v2019_v33  ;;  %v1160_v27 = vld [vmem:[%s2365_s1 + $0x38] sm:$0xff] }
 0x364   :  { %v975_v41 = vpop.permute.xlu0 %974 }
 0x365   :  { %v1028_v54 = vrot.slane %v975_v41, %v2019_v33 }
 0x367   :  { %v1029_v5 = vsel %vm775_vm2, %v1028_v54, %v1024_v58 }
 0x368   :  { %v978_v42 = vpop.permute.xlu0 %977  ;;  %v1084_v59 = vsel %vm840_vm3, %v1029_v5, %v1020_v19  ;;  %v1156_v5 = vld [vmem:[%s2365_s1 + $0x18] sm:$0xff]  ;;  %v1158_v19 = vld [vmem:[%s2365_s1 + $0x28] sm:$0xff] }
 0x369   :  { %v1033_v60 = vrot.slane %v978_v42, %v2016_v32 }
 0x36c   :  { %v981_v16 = vpop.permute.xlu0 %980 }
 0x36d   :  { %v1037_v48 = vrot.slane %v981_v16, %v2019_v33 }
 0x36f   :  { %v1038_v13 = vsel %vm775_vm2, %v1037_v48, %v1033_v60 }
 0x370   :  { %v984_v9 = vpop.permute.xlu0 %983  ;;  %v1085_v61 = vsel %vm842_vm4, %v1038_v13, %v1084_v59 }
 0x371   :  { %v1042_v47 = vrot.slane %v984_v9, %v2016_v32 }
 0x374   :  { %v987_v45 = vpop.permute.xlu0 %986 }
 0x375   :  { %v1046_v51 = vrot.slane %v987_v45, %v2019_v33 }
 0x377   :  { %v1047_v8 = vsel %vm775_vm2, %v1046_v51, %v1042_v47 }
 0x378   :  { %v990_v50 = vpop.permute.xlu0 %989  ;;  %v1086_v35 = vsel %vm844_vm5, %v1047_v8, %v1085_v61 }
 0x379   :  { %v1051_v55 = vrot.slane %v990_v50, %v2016_v32 }
 0x37b   :  { %v1056_v29 = vsel %vm775_vm2, %v1055_v10, %v1051_v55 }
 0x37c   :  { %v996_v43 = vpop.permute.xlu0 %995  ;;  %v1087_v41 = vsel %vm846_vm6, %v1056_v29, %v1086_v35  ;;  %v1159_v35 = vld [vmem:[%s2365_s1 + $0x30] sm:$0xff] }
 0x37d   :  { %v1060_v21 = vrot.slane %v996_v43, %v2016_v32 }
 0x380   :  { %v999_v52 = vpop.permute.xlu0 %998 }
 0x381   :  { %v1064_v4 = vrot.slane %v999_v52, %v2019_v33 }
 0x383   :  { %v1065_v31 = vsel %vm775_vm2, %v1064_v4, %v1060_v21  ;;  %v1155_v4 = vld [vmem:[%s2365_s1 + $0x10] sm:$0xff] }
 0x384   :  { %v1002_v53 = vpop.permute.xlu0 %1001  ;;  %v1088_v16 = vsel %vm848_vm7, %v1065_v31, %v1087_v41 }
 0x385   :  { %v1069_v30 = vrot.slane %v1002_v53, %v2016_v32 }
 0x388   :  { %v1005_v57 = vpop.permute.xlu0 %1004 }
 0x389   :  { %v1073_v22 = vrot.slane %v1005_v57, %v2019_v33 }
 0x38b   :  { %v1074_v38 = vsel %vm775_vm2, %v1073_v22, %v1069_v30  ;;  %v1157_v22 = vld [vmem:[%s2365_s1 + $0x20] sm:$0xff] }
 0x38c   :  { %v1008_v39 = vpop.permute.xlu0 %1007  ;;  %v1089_v45 = vsel %vm850_vm8, %v1074_v38, %v1088_v16  ;;  %v1162_v38 = vld [vmem:[%s2365_s1 + $0x48] sm:$0xff] }
 0x38d   :  { %v1078_v42 = vrot.slane %v1008_v39, %v2016_v32 }
 0x38f   :  { %v1083_v9 = vsel %vm775_vm2, %v1082_v3, %v1078_v42 }
 0x390   :  { %v1090_v50 = vsel %vm852_vm9, %v1083_v9, %v1089_v45 }
 0x391   :  { %v1092_v43 = vsel %vm855_vm10, %v1090_v50, 0.0 }
 0x392   :  { %1093 = vadd.xlane.f32.xlu0 %v1092_v43 }
 0x41f   :  { %v1094_v52 = vpop.xlane.xlu0 %1093 }
 0x420   :  { %1653 = vrcp.f32 %v1094_v52  ;;  %v1655_v52 = vld [vmem:[%s2365_s1 + $0x40] sm:$0xff] }
 0x42a   :  { %v1654_v54 = vpop.eup %1653 }
 0x42b   :  { %v1116_v49 = vrot.slane %v1654_v54, %v1867_v40  ;;  %v1100_v48 = vrot.slane %v1654_v54, %v1786_v12  ;;  %v1128_v58 = vrot.slane %v1654_v54, %v1962_v24  ;;  %v1104_v55 = vrot.slane %v1654_v54, %v1814_v23 }
 0x42d   :  { %v1145_v53 = vmul.f32 %v2109_v7, %v1116_v49  ;;  %v1137_v11 = vmul.f32 %v2068_v56, %v1100_v48  ;;  %v1152_v51 = vmul.f32 %v2089_v15, %v1128_v58  ;;  %v1138_v60 = vmul.f32 %v2073_v62, %v1100_v48 }
 0x42e   :  { %v1139_v40 = vmul.f32 %v2077_v0, %v1104_v55  ;;  %v1140_v12 = vmul.f32 %v2084_v6, %v1104_v55  ;;  %v1108_v7 = vrot.slane %v1654_v54, %v1826_v26  ;;  %v1112_v15 = vrot.slane %v1654_v54, %v1850_v34  ;;  %v1163_v55 = vld [vmem:[%s2365_s1 + $0x50] sm:$0xff] }
 0x42f   :  { %1211 = vperm.xlu0 %1587, %v1145_v53   ;;  %1171 = vperm.xlu1 %1588, %v1137_v11   ;;  %v1146_v0 = vmul.f32 %v2079_v2, %v1116_v49  ;;  %v1120_v6 = vrot.slane %v1654_v54, %v1881_v44  ;;  %v1168_v49 = vld [vmem:[%s2365_s1 + $0x78] sm:$0xff] }
 0x430   :  { %v1141_v24 = vmul.f32 %v2091_v18, %v1108_v7  ;;  %v1142_v56 = vmul.f32 %v2096_v20, %v1108_v7  ;;  %v1143_v23 = vmul.f32 %v2101_v25, %v1112_v15  ;;  %v1144_v62 = vmul.f32 %v2105_v28, %v1112_v15 }
 0x431   :  { %v1147_v26 = vmul.f32 %v2114_v63, %v1120_v6  ;;  %v1148_v18 = vmul.f32 %v2117_v36, %v1120_v6  ;;  %v1124_v20 = vrot.slane %v1654_v54, %v1887_v46  ;;  %v1151_v28 = vmul.f32 %v2126_v14, %v1128_v58  ;;  %v1154_v46 = vld [vmem:[%s2365_s1 + $0x8] sm:$0xff] }
 0x433   :  { %1246 = vperm.xlu0 %1587, %v1152_v51   ;;  %1176 = vperm.xlu1 %1588, %v1138_v60   ;;  %v1149_v34 = vmul.f32 %v2120_v1, %v1124_v20  ;;  %v1150_v25 = vmul.f32 %v2123_v37, %v1124_v20  ;;  %v1153_v37 = vld [vmem:[%s2365_s1] sm:$0xff] }
 0x437   :  { %1181 = vperm.xlu1 %1588, %v1139_v40  }
 0x43b   :  { %1186 = vperm.xlu1 %1588, %v1140_v12  }
 0x43f   :  { %1191 = vperm.xlu1 %1588, %v1141_v24  }
 0x443   :  { %1196 = vperm.xlu1 %1588, %v1142_v56  }
 0x447   :  { %1201 = vperm.xlu1 %1588, %v1143_v23   ;;  %v1164_v23 = vld [vmem:[%s2365_s1 + $0x58] sm:$0xff] }
 0x44b   :  { %1206 = vperm.xlu1 %1588, %v1144_v62  }
 0x44f   :  { %1216 = vperm.xlu1 %1588, %v1146_v0  }
 0x453   :  { %1221 = vperm.xlu1 %1588, %v1147_v26  }
 0x457   :  { %1226 = vperm.xlu1 %1588, %v1148_v18  }
 0x45b   :  { %1231 = vperm.xlu1 %1588, %v1149_v34  }
 0x45f   :  { %1236 = vperm.xlu1 %1588, %v1150_v25  }
 0x463   :  { %1241 = vperm.xlu1 %1588, %v1151_v28  }
 0x4ae   :  { %v2185_v2 = vpop.permute.xlu1 %1171  ;;  %v2228_v29 = vpop.permute.xlu0 %1211 }
 0x4af   :  { %v1249_v47 = vmul.f32 %v2185_v2, %v1153_v37  ;;  %v1257_v54 = vmul.f32 %v1655_v52, %v2228_v29  ;;  %v1376_v6 = vrot.slane %v2228_v29, %v2016_v32  ;;  %v1340_v26 = vrot.slane %v2185_v2, %v2016_v32 }
 0x4b1   :  { %v1265_v21 = vsel %vm80_vm0, %v1249_v47, 0.0  ;;  %v1301_v24 = vsel %vm80_vm0, %v1257_v54, 0.0 }
 0x4b2   :  { %v2187_v44 = vpop.permute.xlu1 %1176  ;;  %v2253_v48 = vpop.permute.xlu0 %1246 }
 0x4b3   :  { %v1250_v14 = vmul.f32 %v2187_v44, %v1154_v46  ;;  %v1264_v56 = vmul.f32 %v2253_v48, %v1168_v49  ;;  %v1344_v28 = vrot.slane %v2187_v44, %v2019_v33 }
 0x4b5   :  { %v1266_v57 = vsel %vm80_vm0, %v1250_v14, 0.0  ;;  %v2276_v14 = vsel %vm80_vm0, %v1264_v56, 0.0 }
 0x4b6   :  { %v2189_v63 = vpop.permute.xlu1 %1181  ;;  %v1267_v30 = vadd.f32 %v1266_v57, %v1265_v21 }
 0x4b7   :  { %v1251_v8 = vmul.f32 %v2189_v63, %v1155_v4  ;;  %v1349_v4 = vrot.slane %v2189_v63, %v2016_v32  ;;  %v1345_v63 = vsel %vm775_vm2, %v1344_v28, %v1340_v26 }
 0x4b8   :  { %v1268_v9 = vrot.slane %v1267_v30, 4 }
 0x4b9   :  { %v1274_v39 = vsel %vm80_vm0, %v1251_v8, 0.0 }
 0x4ba   :  { %v2191_v17 = vpop.permute.xlu1 %1186  ;;  %v1269_v12 = vadd.f32 %v1268_v9, %v1267_v30 }
 0x4bb   :  { %v1252_v13 = vmul.f32 %v2191_v17, %v1156_v5  ;;  %v1353_v46 = vrot.slane %v2191_v17, %v2019_v33  ;;  %v1407_v5 = vrot.slane %v2253_v48, %v2019_v33 }
 0x4bc   :  { %v1270_v25 = vrot.slane %v1269_v12, 2 }
 0x4bd   :  { %v1275_v61 = vsel %vm80_vm0, %v1252_v13, 0.0  ;;  %v1354_v29 = vsel %vm775_vm2, %v1353_v46, %v1349_v4 }
 0x4be   :  { %v2193_v36 = vpop.permute.xlu1 %1191  ;;  %v1276_v42 = vadd.f32 %v1275_v61, %v1274_v39 }
 0x4bf   :  { %v1253_v3 = vmul.f32 %v2193_v36, %v1157_v22  ;;  %v1165_v22 = vld [vmem:[%s2365_s1 + $0x60] sm:$0xff] }
 0x4c0   :  { %v1277_v58 = vrot.slane %v1276_v42, 4 }
 0x4c1   :  { %v1283_v53 = vsel %vm80_vm0, %v1253_v3, 0.0 }
 0x4c2   :  { %v2198_v1 = vpop.permute.xlu1 %1196  ;;  %v1278_v18 = vadd.f32 %v1277_v58, %v1276_v42  ;;  %v1167_v58 = vld [vmem:[%s2365_s1 + $0x70] sm:$0xff] }
 0x4c3   :  { %v1254_v31 = vmul.f32 %v2198_v1, %v1158_v19  ;;  %v1362_v2 = vrot.slane %v2198_v1, %v2019_v33  ;;  %v1358_v19 = vrot.slane %v2193_v36, %v2016_v32 }
 0x4c4   :  { %v1279_v17 = vrot.slane %v1278_v18, 2 }
 0x4c5   :  { %v1284_v45 = vsel %vm80_vm0, %v1254_v31, 0.0  ;;  %v1363_v61 = vsel %vm775_vm2, %v1362_v2, %v1358_v19 }
 0x4c6   :  { %v2211_v10 = vpop.permute.xlu1 %1201  ;;  %v1285_v51 = vadd.f32 %v1284_v45, %v1283_v53  ;;  %v1280_v9 = vadd.f32 %v1279_v17, %v1278_v18 }
 0x4c7   :  { %v1255_v50 = vmul.f32 %v2211_v10, %v1159_v35  ;;  %v1367_v39 = vrot.slane %v2211_v10, %v2016_v32 }
 0x4c8   :  { %v1286_v20 = vrot.slane %v1285_v51, 4 }
 0x4c9   :  { %v1292_v7 = vsel %vm80_vm0, %v1255_v50, 0.0 }
 0x4ca   :  { %v2226_v59 = vpop.permute.xlu1 %1206  ;;  %v1287_v8 = vadd.f32 %v1286_v20, %v1285_v51 }
 0x4cb   :  { %v1256_v41 = vmul.f32 %v2226_v59, %v1160_v27  ;;  %v2291_v27 = vadd.f32 %v1270_v25, %v1269_v12  ;;  %v1371_v30 = vrot.slane %v2226_v59, %v2019_v33  ;;  %v1409_v59 = vsel %vm840_vm3, %v1354_v29, %v1345_v63 }
 0x4cc   :  { %v1288_v45 = vrot.slane %v1287_v8, 2  ;;  %v1410_v48 = vsel %vm842_vm4, %v1363_v61, %v1409_v59 }
 0x4cd   :  { %v1293_v11 = vsel %vm80_vm0, %v1256_v41, 0.0 }
 0x4ce   :  { %v2241_v16 = vpop.permute.xlu1 %1216  ;;  %v1294_v15 = vadd.f32 %v1293_v11, %v1292_v7 }
 0x4cf   :  { %v1258_v43 = vmul.f32 %v2241_v16, %v1162_v38  ;;  %v1380_v36 = vrot.slane %v2241_v16, %v2019_v33  ;;  %v1166_v38 = vld [vmem:[%s2365_s1 + $0x68] sm:$0xff]  ;;  %v1372_v16 = vsel %vm775_vm2, %v1371_v30, %v1367_v39  ;;  %s1656_s1 = scalar_lea.vmem %s1458_s14, 128 }
 0x4d0   :  { %v1295_v47 = vrot.slane %v1294_v15, 4  ;;  %p1657_p0 = scmp.ne.s32.totalorder %s1458_s14, %s1656_s1  ;;  %p1662_p2 = scmp.lt.s32.totalorder %s1656_s1, %s1656_s1 }
 0x4d1   :  { %v1302_v60 = vsel %vm80_vm0, %v1258_v43, 0.0  ;;  %v1381_v53 = vsel %vm775_vm2, %v1380_v36, %v1376_v6  ;;  %v1281_v6 = vrot.slane %v1280_v9, 1 }
 0x4d2   :  { %v1222_v40 = vpop.permute.xlu1 %1221  ;;  %v1303_v62 = vadd.f32 %v1302_v60, %v1301_v24  ;;  %v1296_v31 = vadd.f32 %v1295_v47, %v1294_v15  ;;  %v1289_v15 = vadd.f32 %v1288_v45, %v1287_v8  ;;  %p1663_p3 = por %p1662_p2, %p1661_p1 }
 0x4d3   :  { %v1259_v0 = vmul.f32 %v1222_v40, %v1163_v55  ;;  %v1385_v52 = vrot.slane %v1222_v40, %v2016_v32 }
 0x4d4   :  { %v1304_v13 = vrot.slane %v1303_v62, 4  ;;  %v1297_v10 = vrot.slane %v1296_v31, 2  ;;  %p1664_p4 = pnand %p1663_p3, %p1657_p0 }
 0x4d5   :  { %v1310_v44 = vsel %vm80_vm0, %v1259_v0, 0.0 }
 0x4d6   :  { %v1227_v34 = vpop.permute.xlu1 %1226  ;;  %v1305_v3 = vadd.f32 %v1304_v13, %v1303_v62  ;;  %v1298_v26 = vadd.f32 %v1297_v10, %v1296_v31  ;;  %v1272_v13 = vrot.slane %v2291_v27, 1 }
 0x4d7   :  { %v1260_v37 = vmul.f32 %v1227_v34, %v1164_v23  ;;  %v1389_v41 = vrot.slane %v1227_v34, %v2019_v33 }
 0x4d8   :  { %v1306_v51 = vrot.slane %v1305_v3, 2 }
 0x4d9   :  { %v1311_v57 = vsel %vm80_vm0, %v1260_v37, 0.0  ;;  %v1390_v60 = vsel %vm775_vm2, %v1389_v41, %v1385_v52 }
 0x4da   :  { %v1312_v21 = vadd.f32 %v1311_v57, %v1310_v44  ;;  %v1232_v1 = vpop.permute.xlu1 %1231  ;;  %v1307_v34 = vadd.f32 %v1306_v51, %v1305_v3  ;;  %v1299_v44 = vrot.slane %v1298_v26, 1 }
 0x4db   :  { %v1261_v42 = vmul.f32 %v1232_v1, %v1165_v22  ;;  %v1394_v11 = vrot.slane %v1232_v1, %v2016_v32 }
 0x4dc   :  { %v1313_v35 = vrot.slane %v1312_v21, 4 }
 0x4dd   :  { %v1319_v55 = vsel %vm80_vm0, %v1261_v42, 0.0 }
 0x4de   :  { %v1314_v50 = vadd.f32 %v1313_v35, %v1312_v21  ;;  %v1237_v43 = vpop.permute.xlu1 %1236 }
 0x4df   :  { %v1262_v54 = vmul.f32 %v1237_v43, %v1166_v38  ;;  %v1398_v49 = vrot.slane %v1237_v43, %v2019_v33  ;;  %v1411_v33 = vsel %vm844_vm5, %v1372_v16, %v1410_v48 }
 0x4e0   :  { %v1315_v12 = vrot.slane %v1314_v50, 2  ;;  %v1412_v23 = vsel %vm846_vm6, %v1381_v53, %v1411_v33 }
 0x4e1   :  { %v1320_v40 = vsel %vm80_vm0, %v1262_v54, 0.0  ;;  %v1399_v24 = vsel %vm775_vm2, %v1398_v49, %v1394_v11  ;;  %v1413_v20 = vsel %vm848_vm7, %v1390_v60, %v1412_v23 }
 0x4e2   :  { %v1321_v7 = vadd.f32 %v1320_v40, %v1319_v55  ;;  %v1242_v56 = vpop.permute.xlu1 %1241  ;;  %v1414_v46 = vsel %vm850_vm8, %v1399_v24, %v1413_v20  ;;  %v1316_v37 = vadd.f32 %v1315_v12, %v1314_v50 }
 0x4e3   :  { %v1263_v62 = vmul.f32 %v1242_v56, %v1167_v58  ;;  %v1403_v0 = vrot.slane %v1242_v56, %v2016_v32  ;;  %v1290_v32 = vrot.slane %v1289_v15, 1 }
 0x4e4   :  { %v1322_v18 = vrot.slane %v1321_v7, 4 }
 0x4e5   :  { %v1328_v25 = vsel %vm80_vm0, %v1263_v62, 0.0  ;;  %v1408_v28 = vsel %vm775_vm2, %v1407_v5, %v1403_v0 }
 0x4e6   :  { %v1323_v2 = vadd.f32 %v1322_v18, %v1321_v7  ;;  %v1330_v47 = vadd.f32 %v2276_v14, %v1328_v25  ;;  %v1415_v4 = vsel %vm852_vm9, %v1408_v28, %v1414_v46 }
 0x4e7   :  { %1417 = vst.msk [vmem:[#allocation5] sm:$0xff] %vm855_vm10, %v1415_v4 }
 0x4e8   :  { %v1324_v57 = vrot.slane %v1323_v2, 2  ;;  %v1331_v17 = vrot.slane %v1330_v47, 4 }
 0x4e9   :  { %1667 = shalt.err (!%p1664_p4)
}
 0x4ea   :  { %s1668_s16 = scalar_lea.hbm %s2372_s8, 128 }
 0x4eb   :  { %p1669_p5 = scmp.ne.s32.totalorder %s2372_s8, %s1668_s16  ;;  %p1672_p6 = scmp.lt.u32.totalorder %s1668_s16, %s2372_s8 }
 0x4ed   :  { %p1674_p7 = pnand %p1672_p6, %p1669_p5 }
 0x4ef   :  { %1677 = shalt.err (!%p1674_p7)
}
 0x4f0   :  { %1460 = dma.vmem_to_hbm [thread:$0]  %s1458_s14, 128, %s2372_s8, [#allocation6]   ;;  %v1308_v14 = vrot.slane %v1307_v34, 1  ;;  %v1282_v5 = vadd.f32 %v1281_v6, %v1280_v9  ;;  %v1317_v19 = vrot.slane %v1316_v37, 1  ;;  %v1325_v8 = vadd.f32 %v1324_v57, %v1323_v2 }
 0x4f1   :  { %v1332_v21 = vadd.f32 %v1331_v17, %v1330_v47  ;;  %v1291_v22 = vadd.f32 %v1290_v32, %v1289_v15  ;;  %v1273_v1 = vadd.f32 %v1272_v13, %v2291_v27  ;;  %v1300_v63 = vadd.f32 %v1299_v44, %v1298_v26  ;;  %s1710_s8 = smov [#allocation3]  }
 0x4f2   :  { %v1326_v30 = vrot.slane %v1325_v8, 1  ;;  %v1309_v61 = vadd.f32 %v1308_v14, %v1307_v34  ;;  %v1318_v36 = vadd.f32 %v1317_v19, %v1316_v37  ;;  %s1444_s22 = sshll.u32 %s1710_s8, 4  ;;  %s1445_s22 = int_to_ptr.vmem [resolvable:$true] %s1444_s22 }
 0x4f3   :  { %v1333_v29 = vrot.slane %v1332_v21, 2  ;;  %v1426_v35 = vsel %vm840_vm3, %v1282_v5, %v1273_v1  ;;  %s1678_s23 = scalar_lea.vmem %s1445_s22, 128  ;;  %p1683_p9 = scmp.lt.s32.totalorder %s1445_s22, %s1445_s22 }
 0x4f4   :  { %v1327_v38 = vadd.f32 %v1326_v30, %v1325_v8  ;;  %v1427_v39 = vsel %vm842_vm4, %v1291_v22, %v1426_v35  ;;  %p1679_p8 = scmp.ne.s32.totalorder %s1445_s22, %s1678_s23  ;;  %p1684_p10 = scmp.lt.s32.totalorder %s1678_s23, %s1678_s23 }
 0x4f5   :  { %v1334_v31 = vadd.f32 %v1333_v29, %v1332_v21  ;;  %v1428_v41 = vsel %vm844_vm5, %v1300_v63, %v1427_v39 }
 0x4f6   :  { %v1429_v42 = vsel %vm846_vm6, %v1309_v61, %v1428_v41  ;;  %p1685_p11 = por %p1684_p10, %p1683_p9 }
 0x4f7   :  { %v1335_v3 = vrot.slane %v1334_v31, 1  ;;  %v1430_v27 = vsel %vm848_vm7, %v1318_v36, %v1429_v42 }
 0x4f8   :  { %v1431_v59 = vsel %vm850_vm8, %v1327_v38, %v1430_v27  ;;  %p1686_p12 = pnand %p1685_p11, %p1679_p8 }
 0x4f9   :  { %v1336_v9 = vadd.f32 %v1335_v3, %v1334_v31 }
 0x4fb   :  { %v1432_v45 = vsel %vm852_vm9, %v1336_v9, %v1431_v59 }
 0x4fc   :  { %1434 = vst.msk [vmem:[#allocation3] sm:$0xff] %vm80_vm0, %v1432_v45 }
 0x4fd   :  { %1689 = shalt.err (!%p1686_p12)
}
 0x4fe   :  { %s1690_s26 = scalar_lea.hbm %s2371_s7, 128 }
 0x4ff   :  { %p1691_p13 = scmp.ne.s32.totalorder %s2371_s7, %s1690_s26  ;;  %p1694_p0 = scmp.lt.u32.totalorder %s1690_s26, %s2371_s7 }
 0x501   :  { %p1696_p1 = pnand %p1694_p0, %p1691_p13 }
 0x503   :  { %1699 = shalt.err (!%p1696_p1)
}
 0x504   :  { %1447 = dma.vmem_to_hbm [thread:$0]  %s1445_s22, 128, %s2371_s7, [#allocation4]  }
 0x505   :  { %1700 = dma.done.wait [#allocation4], 128  }
 0x506   :  { %1701 = vsyncadd [#allocation4], 4294967168 }
 0x507   :  { %1702 = dma.done.wait [#allocation6], 128  }
 0x508   :  { %1703 = vsyncadd [#allocation6], 4294967168 }
 0x509   :  { %1467 = vsyncpa [#allocation4], 1 }
 0x50a   :  { %1468 = vsyncpa [#allocation6], 1 }

</bundles_post_ra>
